<compile_context>
chip_gen: v6e
topology: v6e:2x2x1
jax: 0.10.0
libtpu: 0.0.40
codegen_flags: <defaults>
</compile_context>

<pallas_src>
import jax
import jax.numpy as jnp
from jax import lax
from jax.experimental import pallas as pl
from jax.experimental.pallas import tpu as pltpu

LANES = 128
TARGET_BLOCK_ROWS = 2048   # 2048 x 128 x 4 B = 1 MiB f32 tile per input
NCORES = 2                 # leading "parallel" grid axis (v7x has 2 TCs)


def _round_up(x, m):
    return ((x + m - 1) // m) * m


def _mse_partial_sums(pred2d, gt2d, rows):
    """Per-core partial sum-of-squared-error slabs for a (rows, 128) bulk."""
    block_rows = min(TARGET_BLOCK_ROWS, _round_up(rows, 8))
    blocks_total = pl.cdiv(rows, block_rows)
    blocks_per_core = pl.cdiv(blocks_total, NCORES)

    def in_index_map(c, i):
        b = c * blocks_per_core + i
        # Overflow blocks (when blocks_total is not a multiple of NCORES) are
        # clamped to a valid block; their contribution is masked to 0 below.
        return (jnp.minimum(b, blocks_total - 1), 0)

    def kernel(pred_ref, gt_ref, out_ref):
        c = pl.program_id(0)
        i = pl.program_id(1)

        @pl.when(i == 0)
        def _():
            out_ref[...] = jnp.zeros_like(out_ref)

        d = pred_ref[...].astype(jnp.float32) - gt_ref[...].astype(jnp.float32)
        sq = d * d

        # Mask rows past the logical end (partial last tile / overflow blocks).
        b = c * blocks_per_core + i
        row_idx = b * block_rows + lax.broadcasted_iota(
            jnp.int32, (block_rows, LANES), 0)
        out_ref[...] += jnp.where(row_idx < rows, sq, 0.0)

    return pl.pallas_call(
        kernel,
        out_shape=jax.ShapeDtypeStruct((NCORES * block_rows, LANES),
                                       jnp.float32),
        grid_spec=pltpu.PrefetchScalarGridSpec(
            num_scalar_prefetch=0,
            grid=(NCORES, blocks_per_core),
            in_specs=[
                pl.BlockSpec((block_rows, LANES), in_index_map),
                pl.BlockSpec((block_rows, LANES), in_index_map),
            ],
            out_specs=pl.BlockSpec((block_rows, LANES), lambda c, i: (c, 0)),
        ),
        compiler_params=pltpu.CompilerParams(
            dimension_semantics=("parallel", "arbitrary"),
            vmem_limit_bytes=32 * 1024 * 1024,
        ),
    )(pred2d, gt2d)


def mse_loss(depth_pred, depth_gt):
    """Mean squared error, matching torch.nn.MSELoss() (reduction='mean')."""
    assert depth_pred.shape == depth_gt.shape, \
        "shapes must match (no broadcast in nn.MSELoss default use)"
    n_elems = depth_pred.size
    # TODO(synk): n_elems == 0 yields NaN (0/0), same as torch.nn.MSELoss.

    pred = jnp.ravel(depth_pred)
    gt = jnp.ravel(depth_gt)

    rows = n_elems // LANES           # full 128-lane rows handled in-kernel
    tail = n_elems - rows * LANES     # <128 leftover elements handled in JAX

    total = jnp.float32(0.0)

    if rows > 0:
        bulk_pred = pred[: rows * LANES] if tail else pred
        bulk_gt = gt[: rows * LANES] if tail else gt
        partials = _mse_partial_sums(
            bulk_pred.reshape(rows, LANES),
            bulk_gt.reshape(rows, LANES),
            rows,
        )
        total = total + jnp.sum(partials)

    if tail:
        dt = (pred[rows * LANES:].astype(jnp.float32)
              - gt[rows * LANES:].astype(jnp.float32))
        total = total + jnp.sum(dt * dt)

    return (total / jnp.float32(n_elems)).astype(depth_pred.dtype)


if __name__ == "__main__":
    key = jax.random.PRNGKey(0)
    k1, k2 = jax.random.split(key)
    # Depth-map style inputs: N=2, C=4, H=16, W=16 (NCHW, like the PyTorch module).
    depth_pred = jax.random.normal(k1, (2, 4, 16, 16), dtype=jnp.float32)
    depth_gt = jax.random.normal(k2, (2, 4, 16, 16), dtype=jnp.float32)

    loss = mse_loss(depth_pred, depth_gt)
    jax.block_until_ready(loss)

    # Reference check against plain JAX mean((a-b)^2).
    ref = jnp.mean((depth_pred - depth_gt) ** 2)
    assert jnp.allclose(loss, ref, rtol=1e-5, atol=1e-6), (loss, ref)

    # Also exercise a non-128-aligned shape (tail path + partial-tile masking).
    p2 = jax.random.normal(k1, (3, 5, 7, 11), dtype=jnp.float32)
    g2 = jax.random.normal(k2, (3, 5, 7, 11), dtype=jnp.float32)
    loss2 = mse_loss(p2, g2)
    jax.block_until_ready(loss2)
    ref2 = jnp.mean((p2 - g2) ** 2)
    assert jnp.allclose(loss2, ref2, rtol=1e-5, atol=1e-6), (loss2, ref2)

    print("KERNEL_OK")
</pallas_src>

<mosaic_0001>
module attributes {stable_mosaic.version = 11 : i64} {
  func.func @kernel(%arg0: i32, %arg1: i32, %arg2: memref<16x128xf32, #tpu.memory_space<vmem>>, %arg3: memref<16x128xf32, #tpu.memory_space<vmem>>, %arg4: memref<16x128xf32, #tpu.memory_space<vmem>>) attributes {dimension_semantics = [#tpu.dimension_semantics<parallel>, #tpu.dimension_semantics<arbitrary>], iteration_bounds = array<i64: 2, 1>, scalar_prefetch = 0 : i64, scratch_operands = 0 : i64, tpu.core_type = #tpu.core_type<tc>, window_params = [{transform_indices = @transform_0, window_bounds = array<i64: 16, 128>}, {transform_indices = @transform_1, window_bounds = array<i64: 16, 128>}, {transform_indices = @transform_2, window_bounds = array<i64: 16, 128>}]} {
    %c0_i32 = arith.constant 0 : i32
    %0 = arith.cmpi eq, %arg1, %c0_i32 : i32
    %1 = arith.extui %0 : i1 to i32
    %c0_i32_0 = arith.constant 0 : i32
    %2 = arith.cmpi ne, %1, %c0_i32_0 : i32
    scf.if %2 {
      %cst_9 = arith.constant 0.000000e+00 : f32
      %20 = vector.broadcast %cst_9 : f32 to vector<16x128xf32>
      %c0_10 = arith.constant 0 : index
      %c0_11 = arith.constant 0 : index
      %21 = vector.load %arg4[%c0_10, %c0_11] : memref<16x128xf32, #tpu.memory_space<vmem>>, vector<16x128xf32>
      tpu.vector_store %arg4[%c0_10, %c0_11], %20 {strides = array<i32>} : memref<16x128xf32, #tpu.memory_space<vmem>>, vector<16x128xf32>,
    } else {
    }
    %c0 = arith.constant 0 : index
    %c0_1 = arith.constant 0 : index
    %3 = vector.load %arg2[%c0, %c0_1] : memref<16x128xf32, #tpu.memory_space<vmem>>, vector<16x128xf32>
    %c0_2 = arith.constant 0 : index
    %c0_3 = arith.constant 0 : index
    %4 = vector.load %arg3[%c0_2, %c0_3] : memref<16x128xf32, #tpu.memory_space<vmem>>, vector<16x128xf32>
    %5 = arith.subf %3, %4 : vector<16x128xf32>
    %6 = arith.mulf %5, %5 : vector<16x128xf32>
    %c1_i32 = arith.constant 1 : i32
    %7 = arith.muli %arg0, %c1_i32 : i32
    %8 = arith.addi %7, %arg1 : i32
    %c16_i32 = arith.constant 16 : i32
    %9 = arith.muli %8, %c16_i32 : i32
    %10 = tpu.iota {dimensions = array<i32: 0>} : vector<16x128xi32>
    %11 = vector.broadcast %9 : i32 to vector<16x128xi32>
    %12 = arith.addi %11, %10 : vector<16x128xi32>
    %c0_4 = arith.constant 0 : index
    %c0_5 = arith.constant 0 : index
    %13 = vector.load %arg4[%c0_4, %c0_5] : memref<16x128xf32, #tpu.memory_space<vmem>>, vector<16x128xf32>
    %c16_i32_6 = arith.constant 16 : i32
    %14 = vector.broadcast %c16_i32_6 : i32 to vector<16x128xi32>
    %15 = arith.cmpi slt, %12, %14 : vector<16x128xi32>
    %cst = arith.constant 0.000000e+00 : f32
    %16 = vector.broadcast %cst : f32 to vector<16x128xf32>
    %17 = arith.select %15, %6, %16 : vector<16x128xi1>, vector<16x128xf32>
    %18 = arith.addf %13, %17 : vector<16x128xf32>
    %c0_7 = arith.constant 0 : index
    %c0_8 = arith.constant 0 : index
    %19 = vector.load %arg4[%c0_7, %c0_8] : memref<16x128xf32, #tpu.memory_space<vmem>>, vector<16x128xf32>
    tpu.vector_store %arg4[%c0_7, %c0_8], %18 {strides = array<i32>} : memref<16x128xf32, #tpu.memory_space<vmem>>, vector<16x128xf32>,
    return
  }
  func.func @transform_0(%arg0: i32, %arg1: i32) -> (i32, i32) {
    %c1_i32 = arith.constant 1 : i32
    %0 = arith.muli %arg0, %c1_i32 : i32
    %1 = arith.addi %0, %arg1 : i32
    %c0_i32 = arith.constant 0 : i32
    %2 = arith.minsi %1, %c0_i32 : i32
    %c0_i32_0 = arith.constant 0 : i32
    %c0_i32_1 = arith.constant 0 : i32
    return %2, %c0_i32_0 : i32, i32
  }
  func.func @transform_1(%arg0: i32, %arg1: i32) -> (i32, i32) {
    %c1_i32 = arith.constant 1 : i32
    %0 = arith.muli %arg0, %c1_i32 : i32
    %1 = arith.addi %0, %arg1 : i32
    %c0_i32 = arith.constant 0 : i32
    %2 = arith.minsi %1, %c0_i32 : i32
    %c0_i32_0 = arith.constant 0 : i32
    %c0_i32_1 = arith.constant 0 : i32
    return %2, %c0_i32_0 : i32, i32
  }
  func.func @transform_2(%arg0: i32, %arg1: i32) -> (i32, i32) {
    %c0_i32 = arith.constant 0 : i32
    %c0_i32_0 = arith.constant 0 : i32
    return %arg0, %c0_i32 : i32, i32
  }
}

</mosaic_0001>

<bundles_post_ra>
// kernel: tpu_custom_call.1
= control target key start
LH: loop header
LB: loop body
LE: loop exit
PB: predicated region body
PF: predicated region fallthrough
CT: control target
= control target key end

     0   :  { %7 = vsyncpa [#allocation3], 0  ;;  %s889_s0 = inlined_call_operand.hbm [shape: f32[16,128], index: 0, kind: input, shape index: {}]   ;;  %s890_s1 = inlined_call_operand.hbm [shape: f32[16,128], index: 1, kind: input, shape index: {}]   ;;  %s891_s2 = inlined_call_operand.hbm [shape: f32[32,128], index: 2, kind: output, shape index: {}]  }
   0x1   :  { %9 = vsyncpa [#allocation3 + $0x1], 0 }
   0x2   :  { %10 = vsyncpa [#allocation6], 0 }
   0x3   :  { %12 = vsyncpa [#allocation6 + $0x1], 0 }
   0x4   :  { %13 = vsyncpa [#allocation4], 0 }
   0x5   :  { %15 = vsyncpa [#allocation4 + $0x1], 0  ;;  %s695_s9 = smov 0   ;;  %s697_s10 = smov 0  }
   0x6   :  { %s699_s11 = smov 0   ;;  %s701_s12 = smov 0  }
   0x7   :  { %s703_s13 = smov 0   ;;  %s705_s14 = smov 0  }
   0x8   :  { %s707_s15 = smov 0   ;;  %s709_s16 = smov 0  }
   0x9 LB: > { %s391_s17 = sadd.s32 4294967295, %s671_s16   ;;  %s392_s18 = sadd.s32 4294967294, %s671_s16   ;;  %s671_s16 = sphi %s709_s16, %s21_s16   ;;  %s667_s15 = sphi %s707_s15, %s910_s15   ;;  %s663_s14 = sphi %s705_s14, %s909_s14   ;;  %s659_s13 = sphi %s703_s13, %s879_s13   ;;  %s655_s12 = sphi %s701_s12, %s908_s12   ;;  %s651_s11 = sphi %s699_s11, %s907_s11   ;;  %s647_s10 = sphi %s697_s10, %s906_s10   ;;  %s643_s9 = sphi %s695_s9, %s905_s9  }
   0xa   : > { %s33_s19 = sadd.s32 1, %s667_s15  ;;  %p640_p1 = scmp.ne.s32.totalorder %s659_s13, 0 }
   0xb   : > { %p35_p0 = scmp.ge.s32.totalorder %s33_s19, 2  ;;  %p54_p2 = scmp.eq.s32.totalorder %s671_s16, 0 }
   0xc   : > { %p59_p3 = scmp.ne.s32.totalorder %s659_s13, %s655_s12  ;;  %p60_p5 = scmp.eq.s32.totalorder %s391_s17, 0 }
   0xd   : > { %s912_s19 = smov (%p35_p0, %s33_s19), 0  ;;  %p741_p4 = por %p640_p1, %p54_p2 }
   0xe   : > { %p745_p6 = por %p60_p5, %p59_p3  ;;  %s101_s22 = ssub.s32 %s667_s15, %s912_s19 }
   0xf   : > { %p102_p7 = scmp.eq.s32.totalorder %s101_s22, 0  ;;  %s104_s23 = sadd.s32 1, %s651_s11 }
  0x10   : > { %s895_s21 = scalar_select %p745_p6, 1, 0 }
  0x11   : > { %s753_s24 = scalar_select %p102_p7, %s651_s11, %s104_s23  }
  0x12   : > { %p114_p8 = scmp.ne.s32.totalorder %s651_s11, %s647_s10  ;;  %p115_p9 = scmp.eq.s32.totalorder %s391_s17, 1 }
  0x13   : > { %p120_p10 = scmp.ne.s32.totalorder %s647_s10, %s643_s9  ;;  %p121_p11 = scmp.eq.s32.totalorder %s392_s18, 1 }
  0x14   : > { %p759_p12 = por %p115_p9, %p114_p8  ;;  %p431_p1 = scmp.lt.s32.totalorder %s671_s16, 2 }
  0x15   : > { %p764_p0 = por %p121_p11, %p120_p10  ;;  %s673_s27 = smov [#allocation2]  }
  0x16   : > { %s896_s25 = scalar_select %p759_p12, 1, 0 }
  0x17   : > { %s897_s26 = scalar_select %p764_p0, 1, 0 }
  0x18   : > { %s155_s28 = sshll.u32 %s673_s27, 4  ;;  %p771_p2 = pnand %p431_p1, %p741_p4  ;;  %s156_s28 = int_to_ptr.vmem [resolvable:$true] %s155_s28 }
  0x19   : > { %s510_s4 = scalar_lea.hbm %s889_s0, 256 }
  0x1a   : > { %p511_p3 = scmp.ne.s32.totalorder %s889_s0, %s510_s4  ;;  %p512_p5 = pneg %p771_p2 }
  0x1b   : > { %p517_p8 = scmp.lt.s32.totalorder %s510_s4, %s510_s4 }
  0x1c   : > { %p513_p7 = pnand %p512_p5, %p511_p3 }
  0x1e   : > { %p514_p4 = pneg %p513_p7 }
  0x20   : > { %p519_p9 = pnand %p517_p8, %p514_p4 }
  0x22   : > { %522 = shalt.err (!%p519_p9)
}
  0x23   : > { %s523_s7 = scalar_lea.vmem %s156_s28, 256  ;;  %s530_s8 = scalar_lea.vmem %s156_s28, 512 }
  0x24   : > { %p524_p10 = scmp.ne.s32.totalorder %s156_s28, %s523_s7  ;;  %p531_p13 = scmp.lt.s32.totalorder %s156_s28, %s156_s28 }
  0x25   : > { %p532_p0 = scmp.lt.s32.totalorder %s530_s8, %s523_s7 }
  0x26   : > { %p526_p11 = pnand %p524_p10, %p512_p5 }
  0x27   : > { %p533_p12 = por %p532_p0, %p531_p13 }
  0x28   : > { %p527_p1 = pneg %p526_p11 }
  0x2a   : > { %p534_p6 = pnand %p533_p12, %p527_p1 }
  0x2c   : > { %537 = shalt.err (!%p534_p6)
}
  0x2d   : > { %s674_s12 = smov 128   ;;  %s675_s17 = smov 8  }
  0x2e   : > { %423 = dma.hbm_to_vmem [thread:$0]  (!%p771_p2), %s889_s0, 256, %s156_s28, [#allocation3], %s674_s12, %s674_s12, %s675_s17  }
  0x2f   : > { %p401_p3 = scmp.ge.s32.totalorder %s671_s16, 1  ;;  %p187_p7 = scmp.lt.s32.totalorder %s671_s16, 3 }
  0x30   : > { %s676_s23 = smov [#allocation5]   ;;  %s538_s4 = scalar_lea.hbm %s890_s1, 256 }
  0x31   : > { %p796_p4 = pnand %p401_p3, %p187_p7  ;;  %s179_s27 = sshll.u32 %s676_s23, 4  ;;  %s180_s27 = int_to_ptr.vmem [resolvable:$true] %s179_s27 }
  0x32   : > { %p539_p6 = scmp.ne.s32.totalorder %s890_s1, %s538_s4  ;;  %p545_p0 = scmp.lt.s32.totalorder %s538_s4, %s538_s4 }
  0x33   : > { %s899_s22 = scalar_select %p796_p4, 1, 0 }
  0x34   : > { %p541_p12 = pnand %p539_p6, %p512_p5 }
  0x36   : > { %p542_p13 = pneg %p541_p12 }
  0x38   : > { %p547_p8 = pnand %p545_p0, %p542_p13 }
  0x3a   : > { %550 = shalt.err (!%p547_p8)
}
  0x3b   : > { %s551_s28 = scalar_lea.vmem %s180_s27, 256  ;;  %s558_s7 = scalar_lea.vmem %s180_s27, 512 }
  0x3c   : > { %p552_p9 = scmp.ne.s32.totalorder %s180_s27, %s551_s28  ;;  %p559_p1 = scmp.lt.s32.totalorder %s180_s27, %s180_s27 }
  0x3d   : > { %p560_p3 = scmp.lt.s32.totalorder %s558_s7, %s551_s28 }
  0x3e   : > { %p554_p10 = pnand %p552_p9, %p512_p5 }
  0x3f   : > { %p561_p7 = por %p560_p3, %p559_p1 }
  0x40   : > { %p555_p11 = pneg %p554_p10 }
  0x42   : > { %p562_p4 = pnand %p561_p7, %p555_p11 }
  0x44   : > { %565 = shalt.err (!%p562_p4)
}
  0x45   : > { %426 = dma.hbm_to_vmem [thread:$0]  (!%p771_p2), %s890_s1, 256, %s180_s27, [#allocation6], %s674_s12, %s674_s12, %s675_s17  }
  0x46   : > { %p900_p6 = scmp.ne.s32.totalorder %s899_s22, 0 }
  0x47   : > { %s193_s20 = sand.u32 (!%p900_p6), 1, %s659_s13   ;;  %p901_p5 = scmp.ne.s32.totalorder (!%p900_p6), %s895_s21, 0 }
  0x48   : > { %191 = sbr.rel (%p900_p6) target bundleno = 107 (0x6b), region = 28  ;;  %s402_s23 = sshll.u32 (!%p900_p6), %s193_s20, 4 }
  0x49   : > { %s194_s30 = scalar_lea.sflag (!%p900_p6), [#allocation3], %s193_s20  ;;  %s197_s3 = scalar_lea.vmem (!%p900_p6), [#allocation2], %s402_s23 }
  0x4d   : > { %629 = dma.done.wait (%p901_p5), %s194_s30, 256  }
  0x4e   : > { %631 = vsyncadd (%p901_p5), %s194_s30, 4294967040  ;;  %s203_s29 = scalar_lea.sflag [#allocation6], %s193_s20  ;;  %s206_s4 = scalar_lea.vmem [#allocation5], %s402_s23 }
  0x4f   : > { %633 = dma.done.wait (%p901_p5), %s203_s29, 256  }
  0x50   : > { %635 = vsyncadd (%p901_p5), %s203_s29, 4294967040  ;;  %s405_s12 = sshll.u32 %s663_s14, 4  ;;  %v257_v0 = vlaneseq  ;;  %s229_s17 = sand.u32 1, %s647_s10   ;;  %v247_v6 = vld [vmem:[%s197_s3] sm:$0xff]  ;;  %v248_v8 = vld [vmem:[%s197_s3 + $0x8] sm:$0xff] }
  0x51   : > { %v260_v2 = vstv %s405_s12  ;;  %s404_s22 = sshll.u32 %s229_s17, 4  ;;  %v249_v7 = vld [vmem:[%s206_s4] sm:$0xff]  ;;  %v250_v10 = vld [vmem:[%s206_s4 + $0x8] sm:$0xff]  ;;  %s413_s21 = sshll.u32 %s663_s14, 8 }
  0x52   : > { %v258_v1 = vshrl.u32 %v257_v0, 7  ;;  %v251_v9 = vsub.f32 %v247_v6, %v249_v7  ;;  %v252_v11 = vsub.f32 %v248_v8, %v250_v10  ;;  %s231_s27 = scalar_lea.vmem [#allocation7], %s404_s22  ;;  %s834_s7 = scalar_lea.hbm %s891_s2, %s413_s21 }
  0x53   : > { %s287_s5 = sshll.u32 %s231_s27, 4  ;;  %s838_s8 = scalar_lea.sflag [#allocation4], %s229_s17  ;;  %s836_s5 = int_to_ptr.vmem [resolvable:$true] %s287_s5 }
  0x54   : > { %v259_v3 = vadd.s32 8, %v258_v1  ;;  %v261_v4 = vadd.s32 %v260_v2, %v258_v1  ;;  %v253_v12 = vmul.f32 %v251_v9, %v251_v9  ;;  %v254_v13 = vmul.f32 %v252_v11, %v252_v11  ;;  %s566_s14 = scalar_lea.vmem %s836_s5, 256  ;;  %p902_p4 = scmp.ne.s32.totalorder %s896_s25, 0 }
  0x55   : > { %p567_p2 = scmp.ne.s32.totalorder %s836_s5, %s566_s14  ;;  %s677_s18 = smov [#allocation7]  }
  0x56   : > { %v262_v5 = vadd.s32 %v260_v2, %v259_v3  ;;  %vm265_vm0 = vcmp.lt.s32.totalorder %v261_v4, 16  ;;  %s570_s20 = sshll.u32 %s677_s18, 4  ;;  %s571_s20 = int_to_ptr.vmem [resolvable:$false] %s570_s20 }
  0x57   : > { %v267_v14 = vsel %vm265_vm0, %v253_v12, 0.0  ;;  %p568_p12 = pnand %p567_p2, %p902_p4  ;;  %s572_s23 = scalar_lea.vmem %s571_s20, 512 }
  0x58   : > { %vm266_vm1 = vcmp.lt.s32.totalorder %v262_v5, 16  ;;  %271 = vst [vmem:[%s231_s27] sm:$0xff] %v267_v14  ;;  %p573_p0 = scmp.lt.s32.totalorder %s836_s5, %s571_s20  ;;  %p574_p8 = scmp.lt.s32.totalorder %s572_s23, %s566_s14 }
  0x59   : > { %v268_v15 = vsel %vm266_vm1, %v254_v13, 0.0  ;;  %p569_p13 = pneg %p568_p12 }
  0x5a   : > { %272 = vst [vmem:[%s231_s27 + $0x8] sm:$0xff] %v268_v15  ;;  %p575_p9 = por %p574_p8, %p573_p0 }
  0x5c   : > { %p576_p10 = pnand %p575_p9, %p569_p13 }
  0x5e   : > { %579 = shalt.err (!%p576_p10)
}
  0x5f   : > { %s580_s30 = scalar_lea.hbm %s834_s7, 256  ;;  %s584_s4 = scalar_lea.hbm %s891_s2, 512 }
  0x60   : > { %p581_p11 = scmp.ne.s32.totalorder %s834_s7, %s580_s30  ;;  %p585_p7 = scmp.lt.s32.totalorder %s834_s7, %s891_s2 }
  0x61   : > { %p586_p6 = scmp.lt.s32.totalorder %s584_s4, %s580_s30 }
  0x62   : > { %p582_p1 = pnand %p581_p11, %p902_p4 }
  0x63   : > { %p587_p5 = por %p586_p6, %p585_p7 }
  0x64   : > { %p583_p3 = pneg %p582_p1 }
  0x66   : > { %p588_p2 = pnand %p587_p5, %p583_p3 }
  0x68   : > { %591 = shalt.err (!%p588_p2)
}
  0x69   : > { %s678_s22 = smov 128   ;;  %s679_s21 = smov 8  }
  0x6a   : > { %418 = dma.vmem_to_hbm [thread:$0]  (%p902_p4), %s836_s5, 256, %s834_s7, %s838_s8, %s678_s22, %s678_s22, %s679_s21  }
  0x6b PF: > { %s302_s27 = sand.u32 1, %s643_s9   ;;  %p903_p12 = scmp.ne.s32.totalorder %s897_s26, 0 }
  0x6c   : > { %p904_p13 = scmp.ge.s32.totalorder %s671_s16, 2  ;;  %s303_s6 = scalar_lea.sflag [#allocation4], %s302_s27 }
  0x6e   : > { %p428_p0 = pnand %p904_p13, %p903_p12 }
  0x70   : > { %p429_p8 = pneg %p428_p0 }
  0x72   : > { %637 = dma.done.wait (%p429_p8), %s303_s6, 256  }
  0x73   : > { %639 = vsyncadd (%p429_p8), %s303_s6, 4294967040  ;;  %s21_s16 = sadd.s32 1, %s671_s16   ;;  %s905_s9 = smov %s647_s10 }
  0x74   : > { %p18_p9 = scmp.ge.s32.totalorder %s21_s16, 4   ;;  %s906_s10 = smov %s651_s11 }
  0x75   : > { %s907_s11 = smov %s753_s24  ;;  %s908_s12 = smov %s659_s13 }
  0x76   : > { %s879_s13 = smov 0   ;;  %s909_s14 = smov %s667_s15 }
  0x77   : > { %s910_s15 = smov %s912_s19  ;;  %20 = sbr.rel (!%p18_p9) target bundleno = 9 (0x9), region = 90 }
  0x7c   :  { %308 = vsyncpa [#allocation3], 1 }
  0x7d   :  { %310 = vsyncpa [#allocation3 + $0x1], 1 }
  0x7e   :  { %311 = vsyncpa [#allocation6], 1 }
  0x7f   :  { %313 = vsyncpa [#allocation6 + $0x1], 1 }
  0x80   :  { %314 = vsyncpa [#allocation4], 1 }
  0x81   :  { %316 = vsyncpa [#allocation4 + $0x1], 1 }

</bundles_post_ra>
